<compile_context>
chip_gen: v6e
topology: v6e:2x2x1
jax: 0.10.0
libtpu: 0.0.40
codegen_flags: <defaults>
</compile_context>

<pallas_src>
import jax
import jax.numpy as jnp
from jax.experimental import pallas as pl
from jax.experimental.pallas import tpu as pltpu

_LANE = 1024    # lane-dense last dim (multiple of 128)
_MAX_TM = 256   # 256 rows x 1024 lanes x 4 B = 1 MiB f32 block per array


def _normalize_kernel(a_ref, b_ref, c_ref, a_o, b_o, c_o):
    # VaeImageProcessor do_normalize: [0,1] -> [-1,1]; cast fused in-kernel.
    a_o[...] = a_ref[...].astype(jnp.float32) * 2.0 - 1.0
    b_o[...] = b_ref[...].astype(jnp.float32) * 2.0 - 1.0
    c_o[...] = c_ref[...].astype(jnp.float32) * 2.0 - 1.0


def _binarize_kernel(m_ref, m_o):
    # do_binarize + prepare_mask: >= 0.5 -> 1.0 else 0.0
    m = m_ref[...].astype(jnp.float32)
    m_o[...] = jnp.where(m >= 0.5, jnp.float32(1.0), jnp.float32(0.0))


def _flatten_pad(x):
    """Flatten x to a (rows_pad, _LANE) slab. Returns (slab, row_tile, n_valid)."""
    total = x.size
    rows = pl.cdiv(total, _LANE)
    tm = min(_MAX_TM, ((rows + 7) // 8) * 8)        # rows rounded to sublane mult
    rows_pad = ((rows + tm - 1) // tm) * tm
    pad = rows_pad * _LANE - total
    flat = x.reshape(-1)
    if pad:
        flat = jnp.pad(flat, (0, pad))
    return flat.reshape(rows_pad, _LANE), tm, total


def _run_normalize(src, ref, dp):
    assert src.shape == ref.shape == dp.shape
    shape = src.shape
    s2, tm, total = _flatten_pad(src)
    r2, _, _ = _flatten_pad(ref)
    d2, _, _ = _flatten_pad(dp)
    rows_pad = s2.shape[0]
    grid = (rows_pad // tm,)
    spec = pl.BlockSpec((tm, _LANE), lambda i: (i, 0))

    outs = pl.pallas_call(
        _normalize_kernel,
        out_shape=tuple(
            jax.ShapeDtypeStruct((rows_pad, _LANE), jnp.float32) for _ in range(3)),
        grid_spec=pltpu.PrefetchScalarGridSpec(
            num_scalar_prefetch=0,
            grid=grid,
            in_specs=[spec, spec, spec],
            out_specs=[spec, spec, spec],
        ),
        compiler_params=pltpu.CompilerParams(
            dimension_semantics=("parallel",)),
    )(s2, r2, d2)

    return tuple(o.reshape(-1)[:total].reshape(shape) for o in outs)


def _run_binarize(mask):
    shape = mask.shape
    m2, tm, total = _flatten_pad(mask)
    rows_pad = m2.shape[0]
    grid = (rows_pad // tm,)
    spec = pl.BlockSpec((tm, _LANE), lambda i: (i, 0))

    out = pl.pallas_call(
        _binarize_kernel,
        out_shape=jax.ShapeDtypeStruct((rows_pad, _LANE), jnp.float32),
        grid_spec=pltpu.PrefetchScalarGridSpec(
            num_scalar_prefetch=0,
            grid=grid,
            in_specs=[spec],
            out_specs=spec,
        ),
        compiler_params=pltpu.CompilerParams(
            dimension_semantics=("parallel",)),
    )(m2)

    return out.reshape(-1)[:total].reshape(shape)


def transform_forward(batch):
    """Pallas equivalent of Transform.forward on a dict of batched tensors.

    batch['src_image'], batch['ref_image'], batch['densepose']: (B, C, H, W) in [0,1]
    batch['mask']: (B, 1, H, W) in [0,1]
    Returns new dict with images normalized to [-1,1] (float32) and binarized mask.
    """
    src = jnp.asarray(batch['src_image'])   # native dtype; cast fused in kernel
    ref = jnp.asarray(batch['ref_image'])
    dp = jnp.asarray(batch['densepose'])
    mask = jnp.asarray(batch['mask'])

    B, C, H, W = src.shape
    assert mask.shape == (B, 1, H, W)

    src_o, ref_o, dp_o = _run_normalize(src, ref, dp)
    mask_o = _run_binarize(mask)

    out = dict(batch)
    out['src_image'] = src_o
    out['ref_image'] = ref_o
    out['densepose'] = dp_o
    out['mask'] = mask_o
    return out


if __name__ == "__main__":
    # Small shapes consistent with the module: batch=2, C=3, H=W=16
    # (height/width must be multiples of VAE_SCALE_FACTOR=8; 16 satisfies this).
    key = jax.random.PRNGKey(0)
    k1, k2, k3, k4 = jax.random.split(key, 4)
    B, C, H, W = 2, 3, 16, 16

    batch = {
        'src_image': jax.random.uniform(k1, (B, C, H, W), jnp.float32),
        'ref_image': jax.random.uniform(k2, (B, C, H, W), jnp.float32),
        'densepose': jax.random.uniform(k3, (B, C, H, W), jnp.float32),
        'mask': jax.random.uniform(k4, (B, 1, H, W), jnp.float32),
    }

    out = transform_forward(batch)
    jax.block_until_ready(out['src_image'])
    jax.block_until_ready(out['mask'])

    # Reference check in plain JAX.
    ref_src = batch['src_image'] * 2.0 - 1.0
    ref_ref = batch['ref_image'] * 2.0 - 1.0
    ref_dp = batch['densepose'] * 2.0 - 1.0
    ref_mask = jnp.where(batch['mask'] >= 0.5, 1.0, 0.0)

    assert jnp.allclose(out['src_image'], ref_src, atol=1e-6)
    assert jnp.allclose(out['ref_image'], ref_ref, atol=1e-6)
    assert jnp.allclose(out['densepose'], ref_dp, atol=1e-6)
    assert jnp.array_equal(out['mask'], ref_mask)
    assert out['src_image'].shape == (B, C, H, W)
    assert out['src_image'].dtype == jnp.float32
    assert out['mask'].shape == (B, 1, H, W)
    assert out['mask'].dtype == jnp.float32

    print("KERNEL_OK")
</pallas_src>

<mosaic_0001>
module attributes {stable_mosaic.version = 11 : i64} {
  func.func @_normalize_kernel(%arg0: i32, %arg1: memref<8x1024xf32, #tpu.memory_space<vmem>>, %arg2: memref<8x1024xf32, #tpu.memory_space<vmem>>, %arg3: memref<8x1024xf32, #tpu.memory_space<vmem>>, %arg4: memref<8x1024xf32, #tpu.memory_space<vmem>>, %arg5: memref<8x1024xf32, #tpu.memory_space<vmem>>, %arg6: memref<8x1024xf32, #tpu.memory_space<vmem>>) attributes {dimension_semantics = [#tpu.dimension_semantics<parallel>], iteration_bounds = array<i64: 1>, scalar_prefetch = 0 : i64, scratch_operands = 0 : i64, tpu.core_type = #tpu.core_type<tc>, window_params = [{transform_indices = @transform_0, window_bounds = array<i64: 8, 1024>}, {transform_indices = @transform_1, window_bounds = array<i64: 8, 1024>}, {transform_indices = @transform_2, window_bounds = array<i64: 8, 1024>}, {transform_indices = @transform_3, window_bounds = array<i64: 8, 1024>}, {transform_indices = @transform_4, window_bounds = array<i64: 8, 1024>}, {transform_indices = @transform_5, window_bounds = array<i64: 8, 1024>}]} {
    %c0 = arith.constant 0 : index
    %c0_0 = arith.constant 0 : index
    %0 = vector.load %arg1[%c0, %c0_0] : memref<8x1024xf32, #tpu.memory_space<vmem>>, vector<8x1024xf32>
    %cst = arith.constant 2.000000e+00 : f32
    %1 = vector.broadcast %cst : f32 to vector<8x1024xf32>
    %2 = arith.mulf %0, %1 : vector<8x1024xf32>
    %cst_1 = arith.constant 1.000000e+00 : f32
    %3 = vector.broadcast %cst_1 : f32 to vector<8x1024xf32>
    %4 = arith.subf %2, %3 : vector<8x1024xf32>
    %c0_2 = arith.constant 0 : index
    %c0_3 = arith.constant 0 : index
    %5 = vector.load %arg4[%c0_2, %c0_3] : memref<8x1024xf32, #tpu.memory_space<vmem>>, vector<8x1024xf32>
    tpu.vector_store %arg4[%c0_2, %c0_3], %4 {strides = array<i32>} : memref<8x1024xf32, #tpu.memory_space<vmem>>, vector<8x1024xf32>,
    %c0_4 = arith.constant 0 : index
    %c0_5 = arith.constant 0 : index
    %6 = vector.load %arg2[%c0_4, %c0_5] : memref<8x1024xf32, #tpu.memory_space<vmem>>, vector<8x1024xf32>
    %cst_6 = arith.constant 2.000000e+00 : f32
    %7 = vector.broadcast %cst_6 : f32 to vector<8x1024xf32>
    %8 = arith.mulf %6, %7 : vector<8x1024xf32>
    %cst_7 = arith.constant 1.000000e+00 : f32
    %9 = vector.broadcast %cst_7 : f32 to vector<8x1024xf32>
    %10 = arith.subf %8, %9 : vector<8x1024xf32>
    %c0_8 = arith.constant 0 : index
    %c0_9 = arith.constant 0 : index
    %11 = vector.load %arg5[%c0_8, %c0_9] : memref<8x1024xf32, #tpu.memory_space<vmem>>, vector<8x1024xf32>
    tpu.vector_store %arg5[%c0_8, %c0_9], %10 {strides = array<i32>} : memref<8x1024xf32, #tpu.memory_space<vmem>>, vector<8x1024xf32>,
    %c0_10 = arith.constant 0 : index
    %c0_11 = arith.constant 0 : index
    %12 = vector.load %arg3[%c0_10, %c0_11] : memref<8x1024xf32, #tpu.memory_space<vmem>>, vector<8x1024xf32>
    %cst_12 = arith.constant 2.000000e+00 : f32
    %13 = vector.broadcast %cst_12 : f32 to vector<8x1024xf32>
    %14 = arith.mulf %12, %13 : vector<8x1024xf32>
    %cst_13 = arith.constant 1.000000e+00 : f32
    %15 = vector.broadcast %cst_13 : f32 to vector<8x1024xf32>
    %16 = arith.subf %14, %15 : vector<8x1024xf32>
    %c0_14 = arith.constant 0 : index
    %c0_15 = arith.constant 0 : index
    %17 = vector.load %arg6[%c0_14, %c0_15] : memref<8x1024xf32, #tpu.memory_space<vmem>>, vector<8x1024xf32>
    tpu.vector_store %arg6[%c0_14, %c0_15], %16 {strides = array<i32>} : memref<8x1024xf32, #tpu.memory_space<vmem>>, vector<8x1024xf32>,
    return
  }
  func.func @transform_0(%arg0: i32) -> (i32, i32) {
    %c0_i32 = arith.constant 0 : i32
    %c0_i32_0 = arith.constant 0 : i32
    return %arg0, %c0_i32 : i32, i32
  }
  func.func @transform_1(%arg0: i32) -> (i32, i32) {
    %c0_i32 = arith.constant 0 : i32
    %c0_i32_0 = arith.constant 0 : i32
    return %arg0, %c0_i32 : i32, i32
  }
  func.func @transform_2(%arg0: i32) -> (i32, i32) {
    %c0_i32 = arith.constant 0 : i32
    %c0_i32_0 = arith.constant 0 : i32
    return %arg0, %c0_i32 : i32, i32
  }
  func.func @transform_3(%arg0: i32) -> (i32, i32) {
    %c0_i32 = arith.constant 0 : i32
    %c0_i32_0 = arith.constant 0 : i32
    return %arg0, %c0_i32 : i32, i32
  }
  func.func @transform_4(%arg0: i32) -> (i32, i32) {
    %c0_i32 = arith.constant 0 : i32
    %c0_i32_0 = arith.constant 0 : i32
    return %arg0, %c0_i32 : i32, i32
  }
  func.func @transform_5(%arg0: i32) -> (i32, i32) {
    %c0_i32 = arith.constant 0 : i32
    %c0_i32_0 = arith.constant 0 : i32
    return %arg0, %c0_i32 : i32, i32
  }
}

</mosaic_0001>

<bundles_post_ra>
// kernel: tpu_custom_call.1
= control target key start
LH: loop header
LB: loop body
LE: loop exit
PB: predicated region body
PF: predicated region fallthrough
CT: control target
= control target key end

     0   :  { %11 = vsyncpa [#allocation3], 0  ;;  %s428_s0 = inlined_call_operand.hbm [shape: f32[8,1024], index: 0, kind: input, shape index: {}]   ;;  %s429_s1 = inlined_call_operand.hbm [shape: f32[8,1024], index: 1, kind: input, shape index: {}]   ;;  %s430_s2 = inlined_call_operand.hbm [shape: f32[8,1024], index: 2, kind: input, shape index: {}]   ;;  %s431_s3 = inlined_call_operand.hbm [shape: f32[8,1024], index: 3, kind: output, shape index: {0}]   ;;  %s432_s4 = inlined_call_operand.hbm [shape: f32[8,1024], index: 4, kind: output, shape index: {1}]   ;;  %s433_s5 = inlined_call_operand.hbm [shape: f32[8,1024], index: 5, kind: output, shape index: {2}]  }
   0x1   :  { %12 = vsyncpa [#allocation6], 0 }
   0x2   :  { %13 = vsyncpa [#allocation4], 0 }
   0x3   :  { %14 = vsyncpa [#allocation10], 0  ;;  %s351_s18 = smov [#allocation5]   ;;  %s352_s20 = smov [#allocation2]  }
   0x4   :  { %s31_s19 = sshll.u32 %s351_s18, 4  ;;  %s21_s21 = sshll.u32 %s352_s20, 4  ;;  %s32_s19 = int_to_ptr.vmem [resolvable:$true] %s31_s19  ;;  %s22_s21 = int_to_ptr.vmem [resolvable:$true] %s21_s21 }
   0x5   :  { %s231_s22 = scalar_lea.vmem %s32_s19, 1024  ;;  %p236_p1 = scmp.lt.s32.totalorder %s32_s19, %s32_s19 }
   0x6   :  { %p232_p0 = scmp.ne.s32.totalorder %s32_s19, %s231_s22  ;;  %p237_p2 = scmp.lt.s32.totalorder %s231_s22, %s231_s22 }
   0x8   :  { %p238_p3 = por %p237_p2, %p236_p1 }
   0xa   :  { %p239_p4 = pnand %p238_p3, %p232_p0 }
   0xc   :  { %242 = shalt.err (!%p239_p4)
}
   0xd   :  { %34 = dma.hbm_to_vmem [thread:$0]  %s429_s1, 1024, %s32_s19, [#allocation6]  }
   0xe   :  { %s251_s25 = scalar_lea.vmem %s22_s21, 1024  ;;  %p256_p6 = scmp.lt.s32.totalorder %s22_s21, %s22_s21 }
   0xf   :  { %p252_p5 = scmp.ne.s32.totalorder %s22_s21, %s251_s25  ;;  %p257_p7 = scmp.lt.s32.totalorder %s251_s25, %s251_s25 }
  0x11   :  { %p258_p8 = por %p257_p7, %p256_p6 }
  0x13   :  { %p259_p9 = pnand %p258_p8, %p252_p5 }
  0x15   :  { %262 = shalt.err (!%p259_p9)
}
  0x16   :  { %24 = dma.hbm_to_vmem [thread:$0]  %s428_s0, 1024, %s22_s21, [#allocation3]  }
  0x17   :  { %s353_s28 = smov [#allocation7]  }
  0x18   :  { %s41_s29 = sshll.u32 %s353_s28, 4  ;;  %s42_s29 = int_to_ptr.vmem [resolvable:$true] %s41_s29 }
  0x19   :  { %s271_s30 = scalar_lea.vmem %s42_s29, 1024  ;;  %p276_p11 = scmp.lt.s32.totalorder %s42_s29, %s42_s29 }
  0x1a   :  { %p272_p10 = scmp.ne.s32.totalorder %s42_s29, %s271_s30  ;;  %p277_p12 = scmp.lt.s32.totalorder %s271_s30, %s271_s30 }
  0x1c   :  { %p278_p13 = por %p277_p12, %p276_p11 }
  0x1e   :  { %p279_p0 = pnand %p278_p13, %p272_p10 }
  0x20   :  { %282 = shalt.err (!%p279_p0)
}
  0x21   :  { %44 = dma.hbm_to_vmem [thread:$0]  %s430_s2, 1024, %s42_s29, [#allocation6]  }
  0x22   :  { %343 = dma.done.wait [#allocation3], 1024  }
  0x23   :  { %344 = vsyncadd [#allocation3], 4294966272 }
  0x24   :  { %345 = dma.done.wait [#allocation6], 2048  }
  0x25   :  { %346 = vsyncadd [#allocation6], 4294965248  ;;  %s354_s7 = smov [#allocation9]   ;;  %v86_v0 = vld [vmem:[#allocation5] sm:$0xff]  ;;  %v87_v1 = vld [vmem:[#allocation5 + $0x8] sm:$0xff]  ;;  %s355_s8 = smov [#allocation8]  }
  0x26   :  { %s396_s0 = sshll.u32 %s354_s7, 4  ;;  %v88_v2 = vld [vmem:[#allocation5 + $0x10] sm:$0xff]  ;;  %s398_s9 = sshll.u32 %s355_s8, 4  ;;  %v94_v3 = vmul.f32 2.0, %v86_v0  ;;  %v95_v4 = vmul.f32 2.0, %v87_v1  ;;  %v89_v6 = vld [vmem:[#allocation5 + $0x18] sm:$0xff]  ;;  %s401_s0 = int_to_ptr.vmem [resolvable:$true] %s396_s0  ;;  %s404_s9 = int_to_ptr.vmem [resolvable:$true] %s398_s9 }
  0x27   :  { %v96_v5 = vmul.f32 2.0, %v88_v2  ;;  %v90_v7 = vld [vmem:[#allocation5 + $0x20] sm:$0xff]  ;;  %v91_v8 = vld [vmem:[#allocation5 + $0x28] sm:$0xff]  ;;  %v97_v9 = vmul.f32 2.0, %v89_v6  ;;  %v92_v12 = vld [vmem:[#allocation5 + $0x30] sm:$0xff]  ;;  %s356_s2 = smov [#allocation11]   ;;  %p288_p2 = scmp.lt.s32.totalorder %s401_s0, %s401_s0 }
  0x28   :  { %v98_v10 = vmul.f32 2.0, %v90_v7  ;;  %v99_v11 = vmul.f32 2.0, %v91_v8  ;;  %v93_v13 = vld [vmem:[#allocation5 + $0x38] sm:$0xff]  ;;  %v54_v14 = vld [vmem:[#allocation2] sm:$0xff]  ;;  %v201_v15 = vadd.f32 -1.0, %v94_v3  ;;  %v202_v16 = vadd.f32 -1.0, %v95_v4 }
  0x29   :  { %v203_v17 = vadd.f32 -1.0, %v96_v5  ;;  %v100_v18 = vmul.f32 2.0, %v92_v12  ;;  %v55_v19 = vld [vmem:[#allocation2 + $0x8] sm:$0xff]  ;;  %v56_v20 = vld [vmem:[#allocation2 + $0x10] sm:$0xff]  ;;  %v204_v21 = vadd.f32 -1.0, %v97_v9  ;;  %v101_v24 = vmul.f32 2.0, %v93_v13 }
  0x2a   :  { %v205_v22 = vadd.f32 -1.0, %v98_v10  ;;  %v206_v23 = vadd.f32 -1.0, %v99_v11  ;;  %v57_v25 = vld [vmem:[#allocation2 + $0x18] sm:$0xff]  ;;  %v58_v26 = vld [vmem:[#allocation2 + $0x20] sm:$0xff]  ;;  %110 = vst [vmem:[#allocation9] sm:$0xff] %v201_v15  ;;  %111 = vst [vmem:[#allocation9 + $0x8] sm:$0xff] %v202_v16 }
  0x2b   :  { %112 = vst [vmem:[#allocation9 + $0x10] sm:$0xff] %v203_v17  ;;  %v207_v27 = vadd.f32 -1.0, %v100_v18  ;;  %v62_v28 = vmul.f32 2.0, %v54_v14  ;;  %v63_v29 = vmul.f32 2.0, %v55_v19  ;;  %v64_v30 = vmul.f32 2.0, %v56_v20  ;;  %v59_v31 = vld [vmem:[#allocation2 + $0x28] sm:$0xff] }
  0x2c   :  { %v60_v32 = vld [vmem:[#allocation2 + $0x30] sm:$0xff]  ;;  %113 = vst [vmem:[#allocation9 + $0x18] sm:$0xff] %v204_v21  ;;  %114 = vst [vmem:[#allocation9 + $0x20] sm:$0xff] %v205_v22  ;;  %v208_v33 = vadd.f32 -1.0, %v101_v24  ;;  %v65_v34 = vmul.f32 2.0, %v57_v25  ;;  %v66_v35 = vmul.f32 2.0, %v58_v26 }
  0x2d   :  { %115 = vst [vmem:[#allocation9 + $0x28] sm:$0xff] %v206_v23  ;;  %v67_v36 = vmul.f32 2.0, %v59_v31  ;;  %v61_v37 = vld [vmem:[#allocation2 + $0x38] sm:$0xff]  ;;  %v118_v38 = vld [vmem:[#allocation7] sm:$0xff]  ;;  %116 = vst [vmem:[#allocation9 + $0x30] sm:$0xff] %v207_v27  ;;  %v193_v39 = vadd.f32 -1.0, %v62_v28 }
  0x2e   :  { %v194_v40 = vadd.f32 -1.0, %v63_v29  ;;  %v195_v41 = vadd.f32 -1.0, %v64_v30  ;;  %v68_v42 = vmul.f32 2.0, %v60_v32  ;;  %v119_v43 = vld [vmem:[#allocation7 + $0x8] sm:$0xff]  ;;  %v120_v44 = vld [vmem:[#allocation7 + $0x10] sm:$0xff]  ;;  %117 = vst [vmem:[#allocation9 + $0x38] sm:$0xff] %v208_v33 }
  0x2f   :  { %v196_v45 = vadd.f32 -1.0, %v65_v34  ;;  %v197_v46 = vadd.f32 -1.0, %v66_v35  ;;  %v198_v47 = vadd.f32 -1.0, %v67_v36  ;;  %v69_v48 = vmul.f32 2.0, %v61_v37  ;;  %v121_v49 = vld [vmem:[#allocation7 + $0x18] sm:$0xff]  ;;  %v122_v50 = vld [vmem:[#allocation7 + $0x20] sm:$0xff] }
  0x30   :  { %78 = vst [vmem:[#allocation8] sm:$0xff] %v193_v39  ;;  %79 = vst [vmem:[#allocation8 + $0x8] sm:$0xff] %v194_v40  ;;  %v199_v51 = vadd.f32 -1.0, %v68_v42  ;;  %v126_v52 = vmul.f32 2.0, %v118_v38  ;;  %v127_v53 = vmul.f32 2.0, %v119_v43  ;;  %v128_v54 = vmul.f32 2.0, %v120_v44 }
  0x31   :  { %80 = vst [vmem:[#allocation8 + $0x10] sm:$0xff] %v195_v41  ;;  %v123_v55 = vld [vmem:[#allocation7 + $0x28] sm:$0xff]  ;;  %v124_v56 = vld [vmem:[#allocation7 + $0x30] sm:$0xff]  ;;  %81 = vst [vmem:[#allocation8 + $0x18] sm:$0xff] %v196_v45  ;;  %v200_v57 = vadd.f32 -1.0, %v69_v48  ;;  %v129_v58 = vmul.f32 2.0, %v121_v49 }
  0x32   :  { %82 = vst [vmem:[#allocation8 + $0x20] sm:$0xff] %v197_v46  ;;  %83 = vst [vmem:[#allocation8 + $0x28] sm:$0xff] %v198_v47  ;;  %v130_v59 = vmul.f32 2.0, %v122_v50  ;;  %v131_v60 = vmul.f32 2.0, %v123_v55  ;;  %v125_v61 = vld [vmem:[#allocation7 + $0x38] sm:$0xff]  ;;  %s406_s10 = sshll.u32 %s356_s2, 4  ;;  %s177_s10 = int_to_ptr.vmem [resolvable:$true] %s406_s10 }
  0x33   :  { %84 = vst [vmem:[#allocation8 + $0x30] sm:$0xff] %v199_v51  ;;  %v209_v62 = vadd.f32 -1.0, %v126_v52  ;;  %v210_v63 = vadd.f32 -1.0, %v127_v53  ;;  %v211_v0 = vadd.f32 -1.0, %v128_v54  ;;  %v132_v1 = vmul.f32 2.0, %v124_v56  ;;  %s283_s11 = scalar_lea.vmem %s401_s0, 1024 }
  0x34   :  { %p284_p1 = scmp.ne.s32.totalorder %s401_s0, %s283_s11  ;;  %p289_p3 = scmp.lt.s32.totalorder %s283_s11, %s283_s11 }
  0x36   :  { %p290_p4 = por %p289_p3, %p288_p2 }
  0x38   :  { %p291_p5 = pnand %p290_p4, %p284_p1 }
  0x3a   :  { %294 = shalt.err (!%p291_p5)
}
  0x3b   :  { %169 = dma.vmem_to_hbm [thread:$0]  %s401_s0, 1024, %s432_s4, [#allocation10]   ;;  %85 = vst [vmem:[#allocation8 + $0x38] sm:$0xff] %v200_v57  ;;  %v212_v2 = vadd.f32 -1.0, %v129_v58  ;;  %v213_v3 = vadd.f32 -1.0, %v130_v59  ;;  %v214_v4 = vadd.f32 -1.0, %v131_v60 }
  0x3c   :  { %v133_v5 = vmul.f32 2.0, %v125_v61  ;;  %142 = vst [vmem:[#allocation11] sm:$0xff] %v209_v62  ;;  %143 = vst [vmem:[#allocation11 + $0x8] sm:$0xff] %v210_v63  ;;  %v215_v6 = vadd.f32 -1.0, %v132_v1  ;;  %s303_s14 = scalar_lea.vmem %s404_s9, 1024  ;;  %p308_p7 = scmp.lt.s32.totalorder %s404_s9, %s404_s9 }
  0x3d   :  { %144 = vst [vmem:[#allocation11 + $0x10] sm:$0xff] %v211_v0  ;;  %p304_p6 = scmp.ne.s32.totalorder %s404_s9, %s303_s14  ;;  %p309_p8 = scmp.lt.s32.totalorder %s303_s14, %s303_s14 }
  0x3f   :  { %p310_p9 = por %p309_p8, %p308_p7 }
  0x41   :  { %p311_p10 = pnand %p310_p9, %p304_p6 }
  0x43   :  { %314 = shalt.err (!%p311_p10)
}
  0x44   :  { %159 = dma.vmem_to_hbm [thread:$0]  %s404_s9, 1024, %s431_s3, [#allocation4]   ;;  %145 = vst [vmem:[#allocation11 + $0x18] sm:$0xff] %v212_v2  ;;  %146 = vst [vmem:[#allocation11 + $0x20] sm:$0xff] %v213_v3  ;;  %v216_v7 = vadd.f32 -1.0, %v133_v5 }
  0x45   :  { %147 = vst [vmem:[#allocation11 + $0x28] sm:$0xff] %v214_v4  ;;  %148 = vst [vmem:[#allocation11 + $0x30] sm:$0xff] %v215_v6  ;;  %s323_s4 = scalar_lea.vmem %s177_s10, 1024  ;;  %p328_p12 = scmp.lt.s32.totalorder %s177_s10, %s177_s10 }
  0x46   :  { %149 = vst [vmem:[#allocation11 + $0x38] sm:$0xff] %v216_v7  ;;  %p324_p11 = scmp.ne.s32.totalorder %s177_s10, %s323_s4  ;;  %p329_p13 = scmp.lt.s32.totalorder %s323_s4, %s323_s4 }
  0x48   :  { %p330_p0 = por %p329_p13, %p328_p12 }
  0x4a   :  { %p331_p1 = pnand %p330_p0, %p324_p11 }
  0x4c   :  { %334 = shalt.err (!%p331_p1)
}
  0x4d   :  { %179 = dma.vmem_to_hbm [thread:$0]  %s177_s10, 1024, %s433_s5, [#allocation10]  }
  0x4e   :  { %347 = dma.done.wait [#allocation4], 1024  }
  0x4f   :  { %348 = vsyncadd [#allocation4], 4294966272 }
  0x50   :  { %349 = dma.done.wait [#allocation10], 2048  }
  0x51   :  { %350 = vsyncadd [#allocation10], 4294965248 }
  0x52   :  { %189 = vsyncpa [#allocation3], 1 }
  0x53   :  { %190 = vsyncpa [#allocation6], 1 }
  0x54   :  { %191 = vsyncpa [#allocation4], 1 }
  0x55   :  { %192 = vsyncpa [#allocation10], 1 }

</bundles_post_ra>
